<compile_context>
chip_gen: v7x
topology: tpu7x:2x2x1
jax: 0.10.0
libtpu: 0.0.40
codegen_flags: <defaults>
</compile_context>

<pallas_src>
import functools

import jax
import jax.numpy as jnp
from jax.experimental import pallas as pl
from jax.experimental.pallas import tpu as pltpu

_LANE = 128


def _round_up(x, m):
    return (x + m - 1) // m * m


def _round_down(x, m):
    return (x // m) * m


def _soft_dice_kernel(x_ref, y_ref, out_ref, inter_ref, union_ref, *, smooth):
    j = pl.program_id(1)
    last_j = pl.num_programs(1) - 1

    @pl.when(j == 0)
    def _():
        inter_ref[...] = jnp.zeros_like(inter_ref)
        union_ref[...] = jnp.zeros_like(union_ref)

    x = x_ref[...].astype(jnp.float32)          # (tile_r, tile_hw)
    y = y_ref[...].astype(jnp.float32)

    inter_ref[...] += jnp.sum(x * y, axis=-1, keepdims=True)   # (tile_r, 1)
    union_ref[...] += jnp.sum(x + y, axis=-1, keepdims=True)   # (tile_r, 1)

    @pl.when(j == last_j)
    def _():
        # Padded rows (all-zero) yield dice == smooth/smooth == 1.0 exactly;
        # the wrapper subtracts their count, so no in-kernel masking is needed.
        dice = (2.0 * inter_ref[...] + smooth) / (union_ref[...] + smooth)
        # Lane-dense partial-sum output for this row tile (unmasked store).
        out_ref[...] = jnp.broadcast_to(jnp.sum(dice), out_ref.shape)


def soft_dice_loss(inputs, targets, smooth=1e-6):
    """inputs, targets: (N, C, H, W). Returns scalar f32 loss = 1 - mean(dice)."""
    assert inputs.shape == targets.shape and inputs.ndim == 4
    n, c, h, w = inputs.shape
    rows = n * c
    hw = h * w

    isx = jnp.dtype(inputs.dtype).itemsize
    isy = jnp.dtype(targets.dtype).itemsize
    item = max(isx, isy, 1)
    # Sublane packing requirement for the narrowest dtype (f32->8, bf16->16, i8->32).
    sub = max(8 * max(1, 4 // max(isx, 1)), 8 * max(1, 4 // max(isy, 1)))

    # Generation-aware VMEM budget.
    try:
        vmem_cap = int(pltpu.get_tpu_info().vmem_capacity_bytes)
    except Exception:
        vmem_cap = 64 * 1024 * 1024  # conservative (v7x per-TC)
    target_block = int(min(4 << 20, max(1 << 20, vmem_cap // 16)))  # per input block

    # Spatial tile: whole (128-padded) spatial axis if it fits the budget with a
    # minimal row group, otherwise chunk it in multiples of 128 lanes.
    hw_pad = _round_up(hw, _LANE)
    if hw_pad * item * sub <= target_block:
        tile_hw = hw_pad
    else:
        tile_hw = max(_LANE, _round_down(target_block // (sub * item), _LANE))
    # Row tile: fill the remaining budget, multiple of the sublane requirement.
    tile_r = max(sub, _round_down(target_block // (tile_hw * item), sub))
    tile_r = min(tile_r, _round_up(rows, sub))

    hw_total = _round_up(hw, tile_hw)
    rows_total = _round_up(rows, tile_r)
    num_rt = rows_total // tile_r
    num_ht = hw_total // tile_hw
    n_pad_rows = rows_total - rows

    x = inputs.reshape(rows, hw)
    y = targets.reshape(rows, hw)
    if rows_total != rows or hw_total != hw:
        # Zero padding is exact for the sums; padded rows give dice == 1.0 and
        # are subtracted in the wrapper below.
        x = jnp.pad(x, ((0, rows_total - rows), (0, hw_total - hw)))
        y = jnp.pad(y, ((0, rows_total - rows), (0, hw_total - hw)))

    kernel = functools.partial(_soft_dice_kernel, smooth=float(smooth))

    # Explicit scoped-VMEM limit derived from the tile sizes (+ slack).
    vmem_need = (2 * tile_r * tile_hw * (isx + isy)   # double-buffered inputs
                 + 2 * tile_r * _LANE * 4             # two f32 accumulators (lane padded)
                 + 2 * 8 * _LANE * 4)                 # double-buffered output tile
    vmem_limit = int(min(max(vmem_need + (4 << 20), 16 << 20), vmem_cap))

    cost = pl.CostEstimate(
        flops=3 * rows * hw + 6 * rows,
        transcendentals=0,
        bytes_accessed=rows * hw * (isx + isy) + num_rt * 8 * _LANE * 4,
    )

    partial = pl.pallas_call(
        kernel,
        out_shape=jax.ShapeDtypeStruct((num_rt, 8, _LANE), jnp.float32),
        grid_spec=pltpu.PrefetchScalarGridSpec(
            num_scalar_prefetch=0,
            grid=(num_rt, num_ht),
            in_specs=[
                pl.BlockSpec((tile_r, tile_hw), lambda i, j: (i, j)),
                pl.BlockSpec((tile_r, tile_hw), lambda i, j: (i, j)),
            ],
            out_specs=pl.BlockSpec((1, 8, _LANE), lambda i, j: (i, 0, 0)),
            scratch_shapes=[
                pltpu.VMEM((tile_r, 1), jnp.float32),
                pltpu.VMEM((tile_r, 1), jnp.float32),
            ],
        ),
        compiler_params=pltpu.CompilerParams(
            dimension_semantics=("parallel", "arbitrary"),
            vmem_limit_bytes=vmem_limit,
        ),
        cost_estimate=cost,
    )(x, y)

    # Each zero-padded row contributed exactly 1.0 to the dice sum; remove it.
    dice_sum = jnp.sum(partial[:, 0, 0]) - jnp.float32(n_pad_rows)
    return 1.0 - dice_sum / jnp.float32(rows)


if __name__ == "__main__":
    key = jax.random.PRNGKey(0)
    k1, k2 = jax.random.split(key)

    N, C, H, W = 2, 4, 16, 16
    inputs = jax.random.uniform(k1, (N, C, H, W), dtype=jnp.float32)
    targets = (jax.random.uniform(k2, (N, C, H, W)) > 0.5).astype(jnp.float32)

    loss = soft_dice_loss(inputs, targets)
    loss = jax.block_until_ready(loss)

    # Reference (same semantics as the PyTorch module).
    inter = jnp.sum(inputs * targets, axis=(2, 3))
    union = jnp.sum(inputs + targets, axis=(2, 3))
    dice = (2.0 * inter + 1e-6) / (union + 1e-6)
    ref = 1.0 - jnp.mean(dice)

    assert jnp.allclose(loss, ref, atol=1e-5, rtol=1e-5), (loss, ref)
    print("KERNEL_OK")
</pallas_src>

<mosaic_0001>
module attributes {stable_mosaic.version = 11 : i64} {
  func.func @_soft_dice_kernel(%arg0: i32, %arg1: i32, %arg2: memref<8x256xf32, #tpu.memory_space<vmem>>, %arg3: memref<8x256xf32, #tpu.memory_space<vmem>>, %arg4: memref<1x8x128xf32, #tpu.memory_space<vmem>>, %arg5: memref<8x1xf32, #tpu.memory_space<vmem>>, %arg6: memref<8x1xf32, #tpu.memory_space<vmem>>) attributes {dimension_semantics = [#tpu.dimension_semantics<parallel>, #tpu.dimension_semantics<arbitrary>], iteration_bounds = array<i64: 1, 1>, scalar_prefetch = 0 : i64, scratch_operands = 2 : i64, tpu.core_type = #tpu.core_type<tc>, window_params = [{transform_indices = @transform_0, window_bounds = array<i64: 8, 256>}, {transform_indices = @transform_1, window_bounds = array<i64: 8, 256>}, {transform_indices = @transform_2, window_bounds = array<i64: 1, 8, 128>}]} {
    %c0_i32 = arith.constant 0 : i32
    %0 = arith.cmpi eq, %arg1, %c0_i32 : i32
    %1 = arith.extui %0 : i1 to i32
    %c0_i32_0 = arith.constant 0 : i32
    %2 = arith.cmpi ne, %1, %c0_i32_0 : i32
    scf.if %2 {
      %cst_15 = arith.constant 0.000000e+00 : f32
      %20 = vector.broadcast %cst_15 : f32 to vector<8x1xf32>
      %c0_16 = arith.constant 0 : index
      %c0_17 = arith.constant 0 : index
      %21 = vector.load %arg5[%c0_16, %c0_17] : memref<8x1xf32, #tpu.memory_space<vmem>>, vector<8x1xf32>
      tpu.vector_store %arg5[%c0_16, %c0_17], %20 {strides = array<i32>} : memref<8x1xf32, #tpu.memory_space<vmem>>, vector<8x1xf32>,
      %cst_18 = arith.constant 0.000000e+00 : f32
      %22 = vector.broadcast %cst_18 : f32 to vector<8x1xf32>
      %c0_19 = arith.constant 0 : index
      %c0_20 = arith.constant 0 : index
      %23 = vector.load %arg6[%c0_19, %c0_20] : memref<8x1xf32, #tpu.memory_space<vmem>>, vector<8x1xf32>
      tpu.vector_store %arg6[%c0_19, %c0_20], %22 {strides = array<i32>} : memref<8x1xf32, #tpu.memory_space<vmem>>, vector<8x1xf32>,
    } else {
    }
    %c0 = arith.constant 0 : index
    %c0_1 = arith.constant 0 : index
    %3 = vector.load %arg2[%c0, %c0_1] : memref<8x256xf32, #tpu.memory_space<vmem>>, vector<8x256xf32>
    %c0_2 = arith.constant 0 : index
    %c0_3 = arith.constant 0 : index
    %4 = vector.load %arg3[%c0_2, %c0_3] : memref<8x256xf32, #tpu.memory_space<vmem>>, vector<8x256xf32>
    %c0_4 = arith.constant 0 : index
    %c0_5 = arith.constant 0 : index
    %5 = vector.load %arg5[%c0_4, %c0_5] : memref<8x1xf32, #tpu.memory_space<vmem>>, vector<8x1xf32>
    %6 = arith.mulf %3, %4 : vector<8x256xf32>
    %cst = arith.constant dense<0.000000e+00> : vector<8xf32>
    %7 = vector.multi_reduction <add>, %6, %cst [1] : vector<8x256xf32> to vector<8xf32>
    %8 = vector.shape_cast %7 : vector<8xf32> to vector<8x1xf32>
    %9 = arith.addf %5, %8 : vector<8x1xf32>
    %c0_6 = arith.constant 0 : index
    %c0_7 = arith.constant 0 : index
    %10 = vector.load %arg5[%c0_6, %c0_7] : memref<8x1xf32, #tpu.memory_space<vmem>>, vector<8x1xf32>
    tpu.vector_store %arg5[%c0_6, %c0_7], %9 {strides = array<i32>} : memref<8x1xf32, #tpu.memory_space<vmem>>, vector<8x1xf32>,
    %c0_8 = arith.constant 0 : index
    %c0_9 = arith.constant 0 : index
    %11 = vector.load %arg6[%c0_8, %c0_9] : memref<8x1xf32, #tpu.memory_space<vmem>>, vector<8x1xf32>
    %12 = arith.addf %3, %4 : vector<8x256xf32>
    %cst_10 = arith.constant dense<0.000000e+00> : vector<8xf32>
    %13 = vector.multi_reduction <add>, %12, %cst_10 [1] : vector<8x256xf32> to vector<8xf32>
    %14 = vector.shape_cast %13 : vector<8xf32> to vector<8x1xf32>
    %15 = arith.addf %11, %14 : vector<8x1xf32>
    %c0_11 = arith.constant 0 : index
    %c0_12 = arith.constant 0 : index
    %16 = vector.load %arg6[%c0_11, %c0_12] : memref<8x1xf32, #tpu.memory_space<vmem>>, vector<8x1xf32>
    tpu.vector_store %arg6[%c0_11, %c0_12], %15 {strides = array<i32>} : memref<8x1xf32, #tpu.memory_space<vmem>>, vector<8x1xf32>,
    %c0_i32_13 = arith.constant 0 : i32
    %17 = arith.cmpi eq, %arg1, %c0_i32_13 : i32
    %18 = arith.extui %17 : i1 to i32
    %c0_i32_14 = arith.constant 0 : i32
    %19 = arith.cmpi ne, %18, %c0_i32_14 : i32
    scf.if %19 {
      %c0_15 = arith.constant 0 : index
      %c0_16 = arith.constant 0 : index
      %20 = vector.load %arg5[%c0_15, %c0_16] : memref<8x1xf32, #tpu.memory_space<vmem>>, vector<8x1xf32>
      %cst_17 = arith.constant 2.000000e+00 : f32
      %21 = vector.broadcast %cst_17 : f32 to vector<8x1xf32>
      %22 = arith.mulf %21, %20 : vector<8x1xf32>
      %cst_18 = arith.constant 9.99999997E-7 : f32
      %23 = vector.broadcast %cst_18 : f32 to vector<8x1xf32>
      %24 = arith.addf %22, %23 : vector<8x1xf32>
      %c0_19 = arith.constant 0 : index
      %c0_20 = arith.constant 0 : index
      %25 = vector.load %arg6[%c0_19, %c0_20] : memref<8x1xf32, #tpu.memory_space<vmem>>, vector<8x1xf32>
      %cst_21 = arith.constant 9.99999997E-7 : f32
      %26 = vector.broadcast %cst_21 : f32 to vector<8x1xf32>
      %27 = arith.addf %25, %26 : vector<8x1xf32>
      %28 = arith.divf %24, %27 : vector<8x1xf32>
      %29 = vector.shape_cast %28 : vector<8x1xf32> to vector<1x8x1xf32>
      %cst_22 = arith.constant dense<0.000000e+00> : vector<1xf32>
      %30 = vector.multi_reduction <add>, %29, %cst_22 [1, 2] : vector<1x8x1xf32> to vector<1xf32>
      %31 = vector.shape_cast %30 : vector<1xf32> to vector<1x1x1xf32>
      %32 = vector.extract %31[0, 0, 0] : f32 from vector<1x1x1xf32>
      %33 = vector.broadcast %32 : f32 to vector<1x8x128xf32>
      %c0_23 = arith.constant 0 : index
      %c0_24 = arith.constant 0 : index
      %c0_25 = arith.constant 0 : index
      %34 = vector.load %arg4[%c0_23, %c0_24, %c0_25] : memref<1x8x128xf32, #tpu.memory_space<vmem>>, vector<1x8x128xf32>
      tpu.vector_store %arg4[%c0_23, %c0_24, %c0_25], %33 {strides = array<i32>} : memref<1x8x128xf32, #tpu.memory_space<vmem>>, vector<1x8x128xf32>,
    } else {
    }
    return
  }
  func.func @transform_0(%arg0: i32, %arg1: i32) -> (i32, i32) {
    %c0_i32 = arith.constant 0 : i32
    return %arg0, %arg1 : i32, i32
  }
  func.func @transform_1(%arg0: i32, %arg1: i32) -> (i32, i32) {
    %c0_i32 = arith.constant 0 : i32
    return %arg0, %arg1 : i32, i32
  }
  func.func @transform_2(%arg0: i32, %arg1: i32) -> (i32, i32, i32) {
    %c0_i32 = arith.constant 0 : i32
    %c0_i32_0 = arith.constant 0 : i32
    %c0_i32_1 = arith.constant 0 : i32
    return %arg0, %c0_i32, %c0_i32_0 : i32, i32, i32
  }
}

</mosaic_0001>

<bundles_post_ra>
// kernel: tpu_custom_call.1
= control target key start
LH: loop header
LB: loop body
LE: loop exit
PB: predicated region body
PF: predicated region fallthrough
CT: control target
= control target key end

     0   :  { %7 = vsyncpa [#allocation5], 0  ;;  %s242_s0 = inlined_call_operand.hbm [shape: f32[8,256], index: 0, kind: input, shape index: {}]   ;;  %s243_s1 = inlined_call_operand.hbm [shape: f32[8,256], index: 1, kind: input, shape index: {}]   ;;  %s244_s2 = inlined_call_operand.hbm [shape: f32[1,8,128], index: 2, kind: output, shape index: {}]  }
   0x1   :  { %8 = vsyncpa [#allocation8], 0 }
   0x2   :  { %9 = vsyncpa [#allocation6], 0  ;;  %s182_s9 = smov [#allocation4]   ;;  %s183_s11 = smov [#allocation7]  }
   0x3   :  { %s16_s10 = sshll.u32 %s182_s9, 4  ;;  %s26_s12 = sshll.u32 %s183_s11, 4  ;;  %s17_s10 = int_to_ptr.vmem [resolvable:$true] %s16_s10  ;;  %s27_s12 = int_to_ptr.vmem [resolvable:$true] %s26_s12 }
   0x4   :  { %s110_s15 = scalar_lea.hbm %s242_s0, 256 }
   0x5   :  { %p111_p0 = scmp.ne.s32.totalorder %s242_s0, %s110_s15  ;;  %p114_p1 = scmp.lt.u32.totalorder %s110_s15, %s242_s0 }
   0x7   :  { %p116_p2 = pnand %p114_p1, %p111_p0 }
   0x9   :  { %119 = shalt.err (!%p116_p2)
}
   0xa   :  { %s120_s20 = scalar_lea.vmem %s17_s10, 256  ;;  %p125_p4 = scmp.lt.s32.totalorder %s17_s10, %s17_s10 }
   0xb   :  { %p121_p3 = scmp.ne.s32.totalorder %s17_s10, %s120_s20  ;;  %p126_p5 = scmp.lt.s32.totalorder %s120_s20, %s120_s20 }
   0xd   :  { %p127_p6 = por %p126_p5, %p125_p4 }
   0xf   :  { %p128_p7 = pnand %p127_p6, %p121_p3 }
  0x11   :  { %131 = shalt.err (!%p128_p7)
}
  0x12   :  { %19 = dma.hbm_to_vmem [thread:$0]  %s242_s0, 256, %s17_s10, [#allocation5]  }
  0x13   :  { %s132_s25 = scalar_lea.hbm %s243_s1, 256 }
  0x14   :  { %p133_p8 = scmp.ne.s32.totalorder %s243_s1, %s132_s25  ;;  %p136_p9 = scmp.lt.u32.totalorder %s132_s25, %s243_s1 }
  0x16   :  { %p138_p10 = pnand %p136_p9, %p133_p8 }
  0x18   :  { %141 = shalt.err (!%p138_p10)
}
  0x19   :  { %s142_s30 = scalar_lea.vmem %s27_s12, 256  ;;  %p147_p12 = scmp.lt.s32.totalorder %s27_s12, %s27_s12 }
  0x1a   :  { %p143_p11 = scmp.ne.s32.totalorder %s27_s12, %s142_s30  ;;  %p148_p13 = scmp.lt.s32.totalorder %s142_s30, %s142_s30 }
  0x1c   :  { %p149_p0 = por %p148_p13, %p147_p12 }
  0x1e   :  { %p150_p1 = pnand %p149_p0, %p143_p11 }
  0x20   :  { %153 = shalt.err (!%p150_p1)
}
  0x21   :  { %29 = dma.hbm_to_vmem [thread:$0]  %s243_s1, 256, %s27_s12, [#allocation8]  }
  0x22   :  { %176 = dma.done.wait [#allocation5], 256  }
  0x23   :  { %177 = vsyncadd [#allocation5], 4294967040 }
  0x24   :  { %178 = dma.done.wait [#allocation8], 256  }
  0x25   :  { %179 = vsyncadd [#allocation8], 4294967040  ;;  %vm40_vm0 = vcmask 7168   ;;  %v184_v0 = vmov 0.0   ;;  %v43_v1 = vld [vmem:[#allocation4] sm:$0xff]  ;;  %v44_v2 = vld [vmem:[#allocation4 + $0x8] sm:$0xff] }
  0x26   :  { %42 = vst.msk [vmem:[#allocation3] sm:$0xff] %vm40_vm0, %v184_v0  ;;  %41 = vst.msk [vmem:[#allocation2] sm:$0xff] %vm40_vm0, %v184_v0  ;;  %v45_v3 = vld [vmem:[#allocation7] sm:$0xff]  ;;  %v46_v4 = vld [vmem:[#allocation7 + $0x8] sm:$0xff]  ;;  %s185_s1 = smov [#allocation9]  }
  0x27   :  { %v57_v5 = vadd.f32 %v45_v3, %v43_v1  ;;  %v58_v6 = vadd.f32 %v46_v4, %v44_v2  ;;  %v48_v7 = vmul.f32 %v45_v3, %v43_v1  ;;  %v49_v8 = vmul.f32 %v46_v4, %v44_v2  ;;  %s92_s4 = sshll.u32 %s185_s1, 4  ;;  %s93_s4 = int_to_ptr.vmem [resolvable:$true] %s92_s4 }
  0x28   :  { %s154_s6 = scalar_lea.vmem %s93_s4, 128  ;;  %p159_p3 = scmp.lt.s32.totalorder %s93_s4, %s93_s4 }
  0x29   :  { %v59_v9 = vadd.f32 %v58_v6, %v57_v5  ;;  %v50_v10 = vadd.f32 %v49_v8, %v48_v7  ;;  %p155_p2 = scmp.ne.s32.totalorder %s93_s4, %s154_s6  ;;  %p160_p4 = scmp.lt.s32.totalorder %s154_s6, %s154_s6 }
  0x2b   :  { %60 = vadd.xlane.f32.xlu0 %v59_v9  ;;  %p161_p5 = por %p160_p4, %p159_p3 }
  0x2d   :  { %v56_v11 = vld [vmem:[#allocation3] sm:$0xff]  ;;  %v47_v14 = vld [vmem:[#allocation2] sm:$0xff]  ;;  %p162_p6 = pnand %p161_p5, %p155_p2 }
  0x2f   :  { %51 = vadd.xlane.f32.xlu0 %v50_v10 }
  0xb8   :  { %v61_v12 = vpop.xlane.xlu0 %60 }
  0xb9   :  { %v62_v13 = vadd.f32 %v61_v12, %v56_v11 }
  0xbb   :  { %63 = vst.msk [vmem:[#allocation3] sm:$0xff] %vm40_vm0, %v62_v13 }
  0xbc   :  { %v52_v15 = vpop.xlane.xlu0 %51 }
  0xbd   :  { %v53_v16 = vadd.f32 %v52_v15, %v47_v14 }
  0xbf   :  { %55 = vst.msk [vmem:[#allocation2] sm:$0xff] %vm40_vm0, %v53_v16 }
  0xc2   :  { %v70_v17 = vld [vmem:[#allocation3] sm:$0xff] }
  0xc3   :  { %v71_v18 = vadd.f32 1e-06, %v70_v17 }
  0xc5   :  { %108 = vrcp.f32 %v71_v18 }
  0xc6   :  { %v67_v19 = vld [vmem:[#allocation2] sm:$0xff] }
  0xc7   :  { %v68_v20 = vmul.f32 2.0, %v67_v19 }
  0xc9   :  { %v69_v21 = vadd.f32 1e-06, %v68_v20 }
  0xcf   :  { %v109_v22 = vpop.eup %108 }
  0xd0   :  { %v73_v23 = vmul.f32 %v109_v22, %v69_v21 }
  0xd2   :  { %v74_v24 = vsel %vm40_vm0, %v73_v23, 0.0 }
  0xd3   :  { %75 = vadd.xlane.f32.xlu1 %v74_v24 }
 0x160   :  { %v76_v25 = vpop.xlane.xlu1 %75 }
 0x161   :  { %v77_v26 = vrot.slane %v76_v25, 4 }
 0x163   :  { %v78_v27 = vadd.f32 %v77_v26, %v76_v25 }
 0x165   :  { %v79_v28 = vrot.slane %v78_v27, 2 }
 0x167   :  { %v80_v29 = vadd.f32 %v79_v28, %v78_v27 }
 0x169   :  { %v81_v30 = vrot.slane %v80_v29, 1 }
 0x16b   :  { %v82_v31 = vadd.f32 %v81_v30, %v80_v29 }
 0x16d   :  { %102 = vpush %v82_v31 }
 0x19e   :  { %s103_s5 = spop %102 }
 0x19f   :  { %v84_v32 = vstv %s103_s5 }
 0x1a0   :  { %85 = vst [vmem:[#allocation9] sm:$0xff] %v84_v32 }
 0x1a1   :  { %165 = shalt.err (!%p162_p6)
}
 0x1a2   :  { %s166_s9 = scalar_lea.hbm %s244_s2, 128 }
 0x1a3   :  { %p167_p7 = scmp.ne.s32.totalorder %s244_s2, %s166_s9  ;;  %p170_p8 = scmp.lt.u32.totalorder %s166_s9, %s244_s2 }
 0x1a5   :  { %p172_p9 = pnand %p170_p8, %p167_p7 }
 0x1a7   :  { %175 = shalt.err (!%p172_p9)
}
 0x1a8   :  { %95 = dma.vmem_to_hbm [thread:$0]  %s93_s4, 128, %s244_s2, [#allocation6]  }
 0x1a9   :  { %180 = dma.done.wait [#allocation6], 128  }
 0x1aa   :  { %181 = vsyncadd [#allocation6], 4294967168 }
 0x1ab   :  { %99 = vsyncpa [#allocation5], 1 }
 0x1ac   :  { %100 = vsyncpa [#allocation8], 1 }
 0x1ad   :  { %101 = vsyncpa [#allocation6], 1 }

</bundles_post_ra>
